<compile_context>
chip_gen: v5e
topology: v5e:2x2
jax: 0.10.0
libtpu: 0.0.40
codegen_flags: <defaults>
</compile_context>

<pallas_src>
import jax
import jax.numpy as jnp
from jax import lax
from jax.experimental import pallas as pl
from jax.experimental.pallas import tpu as pltpu

_VMEM_LIMIT = 48 * 1024 * 1024  # safe on v7x (64 MiB/TC); plenty on v5e/v6e


def _largest_divisor(n, cap):
    for d in range(min(n, cap), 0, -1):
        if n % d == 0:
            return d
    return 1


# ---------- Kernel 1: Conv1d (patch-matmul) + folded BN + ReLU + GRU input projection ----------
def conv_gi_kernel(p_ref, cw_ref, sc_ref, sh_ref,
                   wir_ref, wiz_ref, win_ref,
                   bir_ref, biz_ref, bin_ref,
                   gr_ref, gz_ref, gn_ref):
    tblk, b, ck = p_ref.shape
    h = cw_ref.shape[1]
    p = p_ref[...].reshape(tblk * b, ck)                              # bf16 patches
    y = jnp.dot(p, cw_ref[...], preferred_element_type=jnp.float32)   # conv as matmul
    y = y * sc_ref[...] + sh_ref[...]                                 # BN + conv bias (folded)
    y = jnp.maximum(y, 0.0).astype(wir_ref.dtype)                     # ReLU, bf16 for MXU
    # Input-to-hidden projection hoisted out of the GRU recurrence; one gate per aligned tile.
    gr = jnp.dot(y, wir_ref[...], preferred_element_type=jnp.float32) + bir_ref[...]
    gz = jnp.dot(y, wiz_ref[...], preferred_element_type=jnp.float32) + biz_ref[...]
    gn = jnp.dot(y, win_ref[...], preferred_element_type=jnp.float32) + bin_ref[...]
    gr_ref[...] = gr.reshape(tblk, b, h).astype(gr_ref.dtype)
    gz_ref[...] = gz.reshape(tblk, b, h).astype(gz_ref.dtype)
    gn_ref[...] = gn.reshape(tblk, b, h).astype(gn_ref.dtype)


def conv_gi(patches, conv_w, scale1, shift1,
            wih_r, wih_z, wih_n, bih_r, bih_z, bih_n, t_block):
    T, B, CK = patches.shape
    H = conv_w.shape[1]
    nt = T // t_block

    def full(a):
        return pl.BlockSpec(a.shape, lambda i: (0,) * a.ndim)

    t_spec_in = pl.BlockSpec((t_block, B, CK), lambda i: (i, 0, 0))
    t_spec_out = pl.BlockSpec((t_block, B, H), lambda i: (i, 0, 0))

    grid_spec = pltpu.PrefetchScalarGridSpec(
        num_scalar_prefetch=0,
        grid=(nt,),
        in_specs=[t_spec_in, full(conv_w), full(scale1), full(shift1),
                  full(wih_r), full(wih_z), full(wih_n),
                  full(bih_r), full(bih_z), full(bih_n)],
        out_specs=(t_spec_out, t_spec_out, t_spec_out),
    )
    out_sds = jax.ShapeDtypeStruct((T, B, H), jnp.bfloat16)
    return pl.pallas_call(
        conv_gi_kernel,
        grid_spec=grid_spec,
        out_shape=(out_sds, out_sds, out_sds),
        compiler_params=pltpu.CompilerParams(
            dimension_semantics=("parallel",),
            vmem_limit_bytes=_VMEM_LIMIT),
    )(patches, conv_w, scale1, shift1, wih_r, wih_z, wih_n, bih_r, bih_z, bih_n)


# ---------- Kernel 2: GRU recurrence (T-tiled) + last-state select + fused dense head ----------
def gru_head_kernel(gr_ref, gz_ref, gn_ref,
                    whr_ref, whz_ref, whn_ref,
                    bhr_ref, bhz_ref, bhn_ref,
                    last_ref,
                    w1_ref, sc2_ref, sh2_ref, w2_ref, b2_ref,
                    out_ref, h_scr, hl_scr):
    tb = pl.program_id(0)
    nt = pl.num_programs(0)
    tblk = gr_ref.shape[0]

    @pl.when(tb == 0)
    def _init():
        h_scr[...] = jnp.zeros_like(h_scr)
        hl_scr[...] = jnp.zeros_like(hl_scr)

    # Loop-invariant loads hoisted out of the recurrence (no per-step re-broadcast).
    whr = whr_ref[...]
    whz = whz_ref[...]
    whn = whn_ref[...]
    bhr = bhr_ref[...]
    bhz = bhz_ref[...]
    bhn = bhn_ref[...]
    last = last_ref[...]            # (B, 1) int32
    t0 = tb * tblk

    def step(j, carry):
        h, hl = carry
        hb = h.astype(whr.dtype)    # bf16 MXU operand, f32 accumulation
        gr = gr_ref[j].astype(jnp.float32)
        gz = gz_ref[j].astype(jnp.float32)
        gn = gn_ref[j].astype(jnp.float32)
        r = jax.nn.sigmoid(gr + jnp.dot(hb, whr, preferred_element_type=jnp.float32) + bhr)
        z = jax.nn.sigmoid(gz + jnp.dot(hb, whz, preferred_element_type=jnp.float32) + bhz)
        n = jnp.tanh(gn + r * (jnp.dot(hb, whn, preferred_element_type=jnp.float32) + bhn))
        h_new = (1.0 - z) * n + z * h
        hl_new = jnp.where(last == (t0 + j), h_new, hl)   # keep only last valid state
        return h_new, hl_new

    h, hl = lax.fori_loop(0, tblk, step, (h_scr[...], hl_scr[...]), unroll=True)
    h_scr[...] = h
    hl_scr[...] = hl

    @pl.when(tb == nt - 1)
    def _epilogue():
        # Fused dense head: Linear -> folded BN -> ReLU -> Linear(->1) as a VPU reduction.
        y = jnp.dot(hl.astype(w1_ref.dtype), w1_ref[...],
                    preferred_element_type=jnp.float32)
        y = jnp.maximum(y * sc2_ref[...] + sh2_ref[...], 0.0)
        out_ref[...] = jnp.sum(y * w2_ref[...], axis=-1, keepdims=True) + b2_ref[...]


def gru_head(gi_r, gi_z, gi_n, whh_r, whh_z, whh_n, bhh_r, bhh_z, bhh_n,
             lastind, w1, scale2, shift2, w2row, b2, t_block):
    T, B, H = gi_r.shape
    nt = T // t_block

    def full(a):
        return pl.BlockSpec(a.shape, lambda i: (0,) * a.ndim)

    gi_spec = pl.BlockSpec((t_block, B, H), lambda i: (i, 0, 0))

    grid_spec = pltpu.PrefetchScalarGridSpec(
        num_scalar_prefetch=0,
        grid=(nt,),
        in_specs=[gi_spec, gi_spec, gi_spec,
                  full(whh_r), full(whh_z), full(whh_n),
                  full(bhh_r), full(bhh_z), full(bhh_n),
                  full(lastind),
                  full(w1), full(scale2), full(shift2), full(w2row), full(b2)],
        out_specs=pl.BlockSpec((B, 1), lambda i: (0, 0)),
        scratch_shapes=[pltpu.VMEM((B, H), jnp.float32),   # h carry
                        pltpu.VMEM((B, H), jnp.float32)],  # selected last state
    )
    return pl.pallas_call(
        gru_head_kernel,
        grid_spec=grid_spec,
        out_shape=jax.ShapeDtypeStruct((B, 1), jnp.float32),
        compiler_params=pltpu.CompilerParams(
            dimension_semantics=("arbitrary",),
            vmem_limit_bytes=_VMEM_LIMIT),
    )(gi_r, gi_z, gi_n, whh_r, whh_z, whh_n, bhh_r, bhh_z, bhh_n,
      lastind, w1, scale2, shift2, w2row, b2)


# ---------------- glue ----------------
def gru_model_forward(x, mask, params, conv_downsample,
                      t_block_conv=128, t_block_gru=32):
    B, C, L = x.shape
    K = conv_downsample
    pad = max(K // 2 - 1, 0)

    # Patch extraction directly in time-major (T, B, C*K) layout.
    xp = jnp.pad(x, ((0, 0), (0, 0), (pad, pad)))
    Lp = L + 2 * pad
    T = (Lp - K) // K + 1
    idx = K * jnp.arange(T)[:, None] + jnp.arange(K)[None, :]        # (T, K)
    patches = xp[:, :, idx]                                          # (B, C, T, K)
    patches = jnp.transpose(patches, (2, 0, 1, 3)).reshape(T, B, C * K)

    # Pad batch to a full sublane (>= 8 rows) so vector ops are not mostly masked.
    B_pad = max(8, ((B + 7) // 8) * 8)
    patches = jnp.pad(patches, ((0, 0), (0, B_pad - B), (0, 0))).astype(jnp.bfloat16)

    tc = _largest_divisor(T, t_block_conv)
    gi_r, gi_z, gi_n = conv_gi(
        patches, params["conv_w"], params["scale1"], params["shift1"],
        params["wih_r"], params["wih_z"], params["wih_n"],
        params["bih_r"], params["bih_z"], params["bih_n"], tc)

    # Last valid conv frame per row (clamped so the kernel always selects a real step).
    # TODO(synk): PyTorch computes sum(mask)//K - 1 with no clamping; lengths that are not
    # multiples of K (or shorter than K) index out of range in the reference model.
    lens = jnp.sum(mask, axis=1).astype(jnp.int32)
    lastind = jnp.clip(lens // K - 1, 0, T - 1)
    lastind = jnp.zeros((B_pad,), jnp.int32).at[:B].set(lastind).reshape(B_pad, 1)

    tg = _largest_divisor(T, t_block_gru)
    out = gru_head(
        gi_r, gi_z, gi_n,
        params["whh_r"], params["whh_z"], params["whh_n"],
        params["bhh_r"], params["bhh_z"], params["bhh_n"],
        lastind, params["w1"], params["scale2"], params["shift2"],
        params["w2"], params["b2"], tg)                              # (B_pad, 1)
    return out[:B, 0]                                                # (B,)


def init_params(key, C, K, H, D):
    ks = jax.random.split(key, 18)
    s = 0.1
    eps = 1e-5
    f32, bf16 = jnp.float32, jnp.bfloat16
    nrm = lambda k, shp: s * jax.random.normal(k, shp, f32)

    conv_w_t = nrm(ks[0], (H, C, K))          # torch Conv1d weight (out, in, k)
    conv_b = nrm(ks[1], (H,))
    bn1_gamma = 1.0 + nrm(ks[2], (H,))
    bn1_beta = nrm(ks[3], (H,))
    bn1_mean = nrm(ks[4], (H,))
    bn1_var = jnp.abs(1.0 + nrm(ks[5], (H,)))

    w_ih = nrm(ks[6], (3 * H, H))             # torch GRU weight_ih_l0, [r, z, n] rows
    w_hh = nrm(ks[7], (3 * H, H))
    b_ih = nrm(ks[8], (3 * H,))
    b_hh = nrm(ks[9], (3 * H,))

    w1_t = nrm(ks[10], (D, H))                # torch Linear weight (out, in)
    b1 = nrm(ks[11], (D,))
    bn2_gamma = 1.0 + nrm(ks[12], (D,))
    bn2_beta = nrm(ks[13], (D,))
    bn2_mean = nrm(ks[14], (D,))
    bn2_var = jnp.abs(1.0 + nrm(ks[15], (D,)))
    w2_t = nrm(ks[16], (1, D))
    b2 = nrm(ks[17], (1,))

    # Fold BatchNorm (inference / running-stats semantics) and the preceding bias into
    # a single scale/shift per channel.
    # TODO(synk): train-mode BatchNorm (batch statistics) and Dropout are not reproduced;
    # Dropout is identity, BN uses running stats.
    scale1 = bn1_gamma / jnp.sqrt(bn1_var + eps)
    shift1 = bn1_beta - bn1_mean * scale1 + conv_b * scale1
    scale2 = bn2_gamma / jnp.sqrt(bn2_var + eps)
    shift2 = bn2_beta - bn2_mean * scale2 + b1 * scale2

    return dict(
        conv_w=conv_w_t.reshape(H, C * K).T.astype(bf16),            # (C*K, H)
        scale1=scale1.reshape(1, H), shift1=shift1.reshape(1, H),
        # Gate weights split into three (H, H) / (H_in, H) matrices so every gate tile is
        # lane-aligned (starts at lane 0) instead of slicing a (B, 3H) result.
        wih_r=w_ih[0:H].T.astype(bf16),
        wih_z=w_ih[H:2 * H].T.astype(bf16),
        wih_n=w_ih[2 * H:3 * H].T.astype(bf16),
        whh_r=w_hh[0:H].T.astype(bf16),
        whh_z=w_hh[H:2 * H].T.astype(bf16),
        whh_n=w_hh[2 * H:3 * H].T.astype(bf16),
        bih_r=b_ih[0:H].reshape(1, H),
        bih_z=b_ih[H:2 * H].reshape(1, H),
        bih_n=b_ih[2 * H:3 * H].reshape(1, H),
        bhh_r=b_hh[0:H].reshape(1, H),
        bhh_z=b_hh[H:2 * H].reshape(1, H),
        bhh_n=b_hh[2 * H:3 * H].reshape(1, H),
        w1=w1_t.T.astype(bf16),                                      # (H, D)
        scale2=scale2.reshape(1, D), shift2=shift2.reshape(1, D),
        w2=w2_t.reshape(1, D), b2=b2.reshape(1, 1),
    )


if __name__ == "__main__":
    B, C, L = 2, 4, 16      # batch, input_channel, input_length
    H, D, K = 32, 32, 4     # gru_dim, dense_dim, conv_downsample

    key = jax.random.PRNGKey(0)
    kx, kp = jax.random.split(key)
    x = jax.random.normal(kx, (B, C, L), jnp.float32)
    # variable-length mask (lengths should be multiples of conv_downsample)
    lens = jnp.array([16, 12], dtype=jnp.int32)
    mask = (jnp.arange(L)[None, :] < lens[:, None]).astype(jnp.float32)

    params = init_params(kp, C, K, H, D)

    # Small T-blocks here so the demo exercises multi-step grids; raise toward 128+
    # (subject to the per-generation VMEM limit) at production sequence lengths.
    out = gru_model_forward(x, mask, params, conv_downsample=K,
                            t_block_conv=2, t_block_gru=2)
    out = jax.block_until_ready(out)
    assert out.shape == (B,)
    assert bool(jnp.all(jnp.isfinite(out)))
    print("KERNEL_OK")
</pallas_src>

<mosaic_0001>
module attributes {stable_mosaic.version = 11 : i64} {
  func.func @conv_gi_kernel(%arg0: i32, %arg1: memref<2x8x16xbf16, #tpu.memory_space<vmem>>, %arg2: memref<16x32xbf16, #tpu.memory_space<vmem>>, %arg3: memref<1x32xf32, #tpu.memory_space<vmem>>, %arg4: memref<1x32xf32, #tpu.memory_space<vmem>>, %arg5: memref<32x32xbf16, #tpu.memory_space<vmem>>, %arg6: memref<32x32xbf16, #tpu.memory_space<vmem>>, %arg7: memref<32x32xbf16, #tpu.memory_space<vmem>>, %arg8: memref<1x32xf32, #tpu.memory_space<vmem>>, %arg9: memref<1x32xf32, #tpu.memory_space<vmem>>, %arg10: memref<1x32xf32, #tpu.memory_space<vmem>>, %arg11: memref<2x8x32xbf16, #tpu.memory_space<vmem>>, %arg12: memref<2x8x32xbf16, #tpu.memory_space<vmem>>, %arg13: memref<2x8x32xbf16, #tpu.memory_space<vmem>>) attributes {dimension_semantics = [#tpu.dimension_semantics<parallel>], iteration_bounds = array<i64: 2>, scalar_prefetch = 0 : i64, scratch_operands = 0 : i64, tpu.core_type = #tpu.core_type<tc>, window_params = [{transform_indices = @transform_0, window_bounds = array<i64: 2, 8, 16>}, {pipeline_mode = #tpu.pipeline_mode<synchronous>, transform_indices = @transform_1, window_bounds = array<i64: 16, 32>}, {pipeline_mode = #tpu.pipeline_mode<synchronous>, transform_indices = @transform_2, window_bounds = array<i64: 1, 32>}, {pipeline_mode = #tpu.pipeline_mode<synchronous>, transform_indices = @transform_3, window_bounds = array<i64: 1, 32>}, {pipeline_mode = #tpu.pipeline_mode<synchronous>, transform_indices = @transform_4, window_bounds = array<i64: 32, 32>}, {pipeline_mode = #tpu.pipeline_mode<synchronous>, transform_indices = @transform_5, window_bounds = array<i64: 32, 32>}, {pipeline_mode = #tpu.pipeline_mode<synchronous>, transform_indices = @transform_6, window_bounds = array<i64: 32, 32>}, {pipeline_mode = #tpu.pipeline_mode<synchronous>, transform_indices = @transform_7, window_bounds = array<i64: 1, 32>}, {pipeline_mode = #tpu.pipeline_mode<synchronous>, transform_indices = @transform_8, window_bounds = array<i64: 1, 32>}, {pipeline_mode = #tpu.pipeline_mode<synchronous>, transform_indices = @transform_9, window_bounds = array<i64: 1, 32>}, {transform_indices = @transform_10, window_bounds = array<i64: 2, 8, 32>}, {transform_indices = @transform_11, window_bounds = array<i64: 2, 8, 32>}, {transform_indices = @transform_12, window_bounds = array<i64: 2, 8, 32>}]} {
    %c0 = arith.constant 0 : index
    %c0_0 = arith.constant 0 : index
    %c0_1 = arith.constant 0 : index
    %0 = vector.load %arg1[%c0, %c0_0, %c0_1] : memref<2x8x16xbf16, #tpu.memory_space<vmem>>, vector<2x8x16xbf16>
    %1 = vector.shape_cast %0 : vector<2x8x16xbf16> to vector<16x16xbf16>
    %c0_2 = arith.constant 0 : index
    %c0_3 = arith.constant 0 : index
    %2 = vector.load %arg2[%c0_2, %c0_3] : memref<16x32xbf16, #tpu.memory_space<vmem>>, vector<16x32xbf16>
    %cst = arith.constant dense<0.000000e+00> : vector<16x32xf32>
    %3 = tpu.matmul %1, %2, %cst {dimension_numbers = #tpu.dot_dimension_numbers<[1], [0], [0], [1], [0, 0, 1, 1], [], []>} : vector<16x16xbf16>, vector<16x32xbf16>, vector<16x32xf32> -> vector<16x32xf32>
    %c0_4 = arith.constant 0 : index
    %c0_5 = arith.constant 0 : index
    %4 = vector.load %arg3[%c0_4, %c0_5] : memref<1x32xf32, #tpu.memory_space<vmem>>, vector<1x32xf32>
    %5 = vector.broadcast %4 : vector<1x32xf32> to vector<16x32xf32>
    %6 = arith.mulf %3, %5 : vector<16x32xf32>
    %c0_6 = arith.constant 0 : index
    %c0_7 = arith.constant 0 : index
    %7 = vector.load %arg4[%c0_6, %c0_7] : memref<1x32xf32, #tpu.memory_space<vmem>>, vector<1x32xf32>
    %8 = vector.broadcast %7 : vector<1x32xf32> to vector<16x32xf32>
    %9 = arith.addf %6, %8 : vector<16x32xf32>
    %cst_8 = arith.constant 0.000000e+00 : f32
    %10 = vector.broadcast %cst_8 : f32 to vector<16x32xf32>
    %11 = arith.maximumf %9, %10 : vector<16x32xf32>
    %12 = arith.truncf %11 : vector<16x32xf32> to vector<16x32xbf16>
    %c0_9 = arith.constant 0 : index
    %c0_10 = arith.constant 0 : index
    %13 = vector.load %arg5[%c0_9, %c0_10] : memref<32x32xbf16, #tpu.memory_space<vmem>>, vector<32x32xbf16>
    %cst_11 = arith.constant dense<0.000000e+00> : vector<16x32xf32>
    %14 = tpu.matmul %12, %13, %cst_11 {dimension_numbers = #tpu.dot_dimension_numbers<[1], [0], [0], [1], [0, 0, 1, 1], [], []>} : vector<16x32xbf16>, vector<32x32xbf16>, vector<16x32xf32> -> vector<16x32xf32>
    %c0_12 = arith.constant 0 : index
    %c0_13 = arith.constant 0 : index
    %15 = vector.load %arg8[%c0_12, %c0_13] : memref<1x32xf32, #tpu.memory_space<vmem>>, vector<1x32xf32>
    %16 = vector.broadcast %15 : vector<1x32xf32> to vector<16x32xf32>
    %17 = arith.addf %14, %16 : vector<16x32xf32>
    %c0_14 = arith.constant 0 : index
    %c0_15 = arith.constant 0 : index
    %18 = vector.load %arg6[%c0_14, %c0_15] : memref<32x32xbf16, #tpu.memory_space<vmem>>, vector<32x32xbf16>
    %cst_16 = arith.constant dense<0.000000e+00> : vector<16x32xf32>
    %19 = tpu.matmul %12, %18, %cst_16 {dimension_numbers = #tpu.dot_dimension_numbers<[1], [0], [0], [1], [0, 0, 1, 1], [], []>} : vector<16x32xbf16>, vector<32x32xbf16>, vector<16x32xf32> -> vector<16x32xf32>
    %c0_17 = arith.constant 0 : index
    %c0_18 = arith.constant 0 : index
    %20 = vector.load %arg9[%c0_17, %c0_18] : memref<1x32xf32, #tpu.memory_space<vmem>>, vector<1x32xf32>
    %21 = vector.broadcast %20 : vector<1x32xf32> to vector<16x32xf32>
    %22 = arith.addf %19, %21 : vector<16x32xf32>
    %c0_19 = arith.constant 0 : index
    %c0_20 = arith.constant 0 : index
    %23 = vector.load %arg7[%c0_19, %c0_20] : memref<32x32xbf16, #tpu.memory_space<vmem>>, vector<32x32xbf16>
    %cst_21 = arith.constant dense<0.000000e+00> : vector<16x32xf32>
    %24 = tpu.matmul %12, %23, %cst_21 {dimension_numbers = #tpu.dot_dimension_numbers<[1], [0], [0], [1], [0, 0, 1, 1], [], []>} : vector<16x32xbf16>, vector<32x32xbf16>, vector<16x32xf32> -> vector<16x32xf32>
    %c0_22 = arith.constant 0 : index
    %c0_23 = arith.constant 0 : index
    %25 = vector.load %arg10[%c0_22, %c0_23] : memref<1x32xf32, #tpu.memory_space<vmem>>, vector<1x32xf32>
    %26 = vector.broadcast %25 : vector<1x32xf32> to vector<16x32xf32>
    %27 = arith.addf %24, %26 : vector<16x32xf32>
    %28 = vector.shape_cast %17 : vector<16x32xf32> to vector<2x8x32xf32>
    %29 = arith.truncf %28 : vector<2x8x32xf32> to vector<2x8x32xbf16>
    %c0_24 = arith.constant 0 : index
    %c0_25 = arith.constant 0 : index
    %c0_26 = arith.constant 0 : index
    %30 = vector.load %arg11[%c0_24, %c0_25, %c0_26] : memref<2x8x32xbf16, #tpu.memory_space<vmem>>, vector<2x8x32xbf16>
    tpu.vector_store %arg11[%c0_24, %c0_25, %c0_26], %29 {strides = array<i32>} : memref<2x8x32xbf16, #tpu.memory_space<vmem>>, vector<2x8x32xbf16>,
    %31 = vector.shape_cast %22 : vector<16x32xf32> to vector<2x8x32xf32>
    %32 = arith.truncf %31 : vector<2x8x32xf32> to vector<2x8x32xbf16>
    %c0_27 = arith.constant 0 : index
    %c0_28 = arith.constant 0 : index
    %c0_29 = arith.constant 0 : index
    %33 = vector.load %arg12[%c0_27, %c0_28, %c0_29] : memref<2x8x32xbf16, #tpu.memory_space<vmem>>, vector<2x8x32xbf16>
    tpu.vector_store %arg12[%c0_27, %c0_28, %c0_29], %32 {strides = array<i32>} : memref<2x8x32xbf16, #tpu.memory_space<vmem>>, vector<2x8x32xbf16>,
    %34 = vector.shape_cast %27 : vector<16x32xf32> to vector<2x8x32xf32>
    %35 = arith.truncf %34 : vector<2x8x32xf32> to vector<2x8x32xbf16>
    %c0_30 = arith.constant 0 : index
    %c0_31 = arith.constant 0 : index
    %c0_32 = arith.constant 0 : index
    %36 = vector.load %arg13[%c0_30, %c0_31, %c0_32] : memref<2x8x32xbf16, #tpu.memory_space<vmem>>, vector<2x8x32xbf16>
    tpu.vector_store %arg13[%c0_30, %c0_31, %c0_32], %35 {strides = array<i32>} : memref<2x8x32xbf16, #tpu.memory_space<vmem>>, vector<2x8x32xbf16>,
    return
  }
  func.func @transform_0(%arg0: i32) -> (i32, i32, i32) {
    %c0_i32 = arith.constant 0 : i32
    %c0_i32_0 = arith.constant 0 : i32
    %c0_i32_1 = arith.constant 0 : i32
    return %arg0, %c0_i32, %c0_i32_0 : i32, i32, i32
  }
  func.func @transform_1(%arg0: i32) -> (i32, i32) {
    %c0_i32 = arith.constant 0 : i32
    %c0_i32_0 = arith.constant 0 : i32
    %c0_i32_1 = arith.constant 0 : i32
    return %c0_i32, %c0_i32_0 : i32, i32
  }
  func.func @transform_2(%arg0: i32) -> (i32, i32) {
    %c0_i32 = arith.constant 0 : i32
    %c0_i32_0 = arith.constant 0 : i32
    %c0_i32_1 = arith.constant 0 : i32
    return %c0_i32, %c0_i32_0 : i32, i32
  }
  func.func @transform_3(%arg0: i32) -> (i32, i32) {
    %c0_i32 = arith.constant 0 : i32
    %c0_i32_0 = arith.constant 0 : i32
    %c0_i32_1 = arith.constant 0 : i32
    return %c0_i32, %c0_i32_0 : i32, i32
  }
  func.func @transform_4(%arg0: i32) -> (i32, i32) {
    %c0_i32 = arith.constant 0 : i32
    %c0_i32_0 = arith.constant 0 : i32
    %c0_i32_1 = arith.constant 0 : i32
    return %c0_i32, %c0_i32_0 : i32, i32
  }
  func.func @transform_5(%arg0: i32) -> (i32, i32) {
    %c0_i32 = arith.constant 0 : i32
    %c0_i32_0 = arith.constant 0 : i32
    %c0_i32_1 = arith.constant 0 : i32
    return %c0_i32, %c0_i32_0 : i32, i32
  }
  func.func @transform_6(%arg0: i32) -> (i32, i32) {
    %c0_i32 = arith.constant 0 : i32
    %c0_i32_0 = arith.constant 0 : i32
    %c0_i32_1 = arith.constant 0 : i32
    return %c0_i32, %c0_i32_0 : i32, i32
  }
  func.func @transform_7(%arg0: i32) -> (i32, i32) {
    %c0_i32 = arith.constant 0 : i32
    %c0_i32_0 = arith.constant 0 : i32
    %c0_i32_1 = arith.constant 0 : i32
    return %c0_i32, %c0_i32_0 : i32, i32
  }
  func.func @transform_8(%arg0: i32) -> (i32, i32) {
    %c0_i32 = arith.constant 0 : i32
    %c0_i32_0 = arith.constant 0 : i32
    %c0_i32_1 = arith.constant 0 : i32
    return %c0_i32, %c0_i32_0 : i32, i32
  }
  func.func @transform_9(%arg0: i32) -> (i32, i32) {
    %c0_i32 = arith.constant 0 : i32
    %c0_i32_0 = arith.constant 0 : i32
    %c0_i32_1 = arith.constant 0 : i32
    return %c0_i32, %c0_i32_0 : i32, i32
  }
  func.func @transform_10(%arg0: i32) -> (i32, i32, i32) {
    %c0_i32 = arith.constant 0 : i32
    %c0_i32_0 = arith.constant 0 : i32
    %c0_i32_1 = arith.constant 0 : i32
    return %arg0, %c0_i32, %c0_i32_0 : i32, i32, i32
  }
  func.func @transform_11(%arg0: i32) -> (i32, i32, i32) {
    %c0_i32 = arith.constant 0 : i32
    %c0_i32_0 = arith.constant 0 : i32
    %c0_i32_1 = arith.constant 0 : i32
    return %arg0, %c0_i32, %c0_i32_0 : i32, i32, i32
  }
  func.func @transform_12(%arg0: i32) -> (i32, i32, i32) {
    %c0_i32 = arith.constant 0 : i32
    %c0_i32_0 = arith.constant 0 : i32
    %c0_i32_1 = arith.constant 0 : i32
    return %arg0, %c0_i32, %c0_i32_0 : i32, i32, i32
  }
}

</mosaic_0001>

<bundles_post_ra>
// kernel: tpu_custom_call.1
= control target key start
LH: loop header
LB: loop body
LE: loop exit
PB: predicated region body
PF: predicated region fallthrough
CT: control target
= control target key end

     0   :  { %s1749_s0 = inlined_call_operand.hbm [shape: bf16[4,8,16], index: 0, kind: input, shape index: {}]   ;;  %s1750_s1 = inlined_call_operand.hbm [shape: bf16[16,32], index: 1, kind: input, shape index: {}]   ;;  %s1751_s2 = inlined_call_operand.vmem [shape: f32[1,32], index: 2, kind: input, shape index: {}]   ;;  %s1752_s3 = inlined_call_operand.vmem [shape: f32[1,32], index: 3, kind: input, shape index: {}]   ;;  %s1753_s4 = inlined_call_operand.hbm [shape: bf16[32,32], index: 4, kind: input, shape index: {}]   ;;  %s1754_s5 = inlined_call_operand.hbm [shape: bf16[32,32], index: 5, kind: input, shape index: {}]   ;;  %s1755_s6 = inlined_call_operand.hbm [shape: bf16[32,32], index: 6, kind: input, shape index: {}]   ;;  %s1756_s7 = inlined_call_operand.vmem [shape: f32[1,32], index: 7, kind: input, shape index: {}]   ;;  %s1757_s8 = inlined_call_operand.vmem [shape: f32[1,32], index: 8, kind: input, shape index: {}]   ;;  %s1758_s9 = inlined_call_operand.vmem [shape: f32[1,32], index: 9, kind: input, shape index: {}]   ;;  %s1759_s10 = inlined_call_operand.hbm [shape: bf16[4,8,32], index: 10, kind: output, shape index: {0}]   ;;  %s1760_s11 = inlined_call_operand.hbm [shape: bf16[4,8,32], index: 11, kind: output, shape index: {1}]   ;;  %s1761_s12 = inlined_call_operand.hbm [shape: bf16[4,8,32], index: 12, kind: output, shape index: {2}]  }
   0x1   :  { %1767 = sst [smem:[#allocation22_spill]] %s1749_s0 }
   0x2   :  { %1768 = sst [smem:[#allocation23_spill]] %s1750_s1 }
   0x3   :  { %1769 = sst [smem:[#allocation24_spill]] %s1751_s2 }
   0x4   :  { %1770 = sst [smem:[#allocation25_spill]] %s1752_s3 }
   0x5   :  { %1771 = sst [smem:[#allocation26_spill]] %s1753_s4 }
   0x6   :  { %1772 = sst [smem:[#allocation27_spill]] %s1754_s5 }
   0x7   :  { %1773 = sst [smem:[#allocation28_spill]] %s1755_s6 }
   0x8   :  { %1774 = sst [smem:[#allocation29_spill]] %s1756_s7 }
   0x9   :  { %18 = vsyncpa [#allocation3], 0 }
   0xa   :  { %20 = vsyncpa [#allocation3 + $0x1], 0 }
   0xb   :  { %21 = vsyncpa [#allocation6], 0 }
   0xc   :  { %22 = vsyncpa [#allocation9], 0 }
   0xd   :  { %23 = vsyncpa [#allocation4], 0 }
   0xe   :  { %25 = vsyncpa [#allocation4 + $0x1], 0 }
   0xf   :  { %26 = vsyncpa [#allocation13], 0 }
  0x10   :  { %28 = vsyncpa [#allocation13 + $0x1], 0  ;;  %s1467_s21 = smov 0   ;;  %s1469_s22 = smov 0  }
  0x11   :  { %s1471_s23 = smov 0   ;;  %s1473_s24 = smov 0  }
  0x12 LB: > { %1775 = sst [smem:[#allocation20_spill]] %s1380_s21  ;;  %s1488_s25 = sadd.s32 4294967295, %s1392_s24   ;;  %s1392_s24 = sphi %s1473_s24, %s1800_s24   ;;  %s1388_s23 = sphi %s1471_s23, %s1799_s23   ;;  %s1384_s22 = sphi %s1469_s22, %s1798_s22   ;;  %s1380_s21 = sphi %s1467_s21, %s1797_s21  }
  0x13   : > { %s1762_s26 = sadd.s32 4294967294, %s1392_s24   ;;  %p54_p0 = scmp.ne.s32.totalorder %s1384_s22, %s1380_s21 }
  0x14   : > { %p55_p1 = scmp.eq.s32.totalorder %s1488_s25, 0  ;;  %p267_p2 = scmp.eq.s32.totalorder %s1488_s25, 1 }
  0x15   : > { %p273_p3 = scmp.eq.s32.totalorder %s1762_s26, 1  ;;  %p925_p5 = scmp.ge.s32.totalorder %s1392_s24, 1 }
  0x16   : > { %p1499_p4 = por %p55_p1, %p54_p0  ;;  %p332_p7 = scmp.lt.s32.totalorder %s1392_s24, 3 }
  0x17   : > { %p1504_p6 = por %p273_p3, %p54_p0  ;;  %s1779_s1 = sld [smem:[#allocation23_spill]] }
  0x18   : > { %p1512_p8 = pnand %p925_p5, %p332_p7  ;;  %s1394_s15 = smov [#allocation5]  }
  0x19   : > { %s1777_s28 = scalar_select %p1504_p6, 1, 0 }
  0x1a   : > { %p1026_p9 = pneg %p1512_p8  ;;  %s345_s16 = sshll.u32 %s1394_s15, 4  ;;  %s346_s16 = int_to_ptr.vmem [resolvable:$true] %s345_s16 }
  0x1b   : > { %1778 = sst [smem:[#allocation21_spill]] %s1777_s28  ;;  %s1765_s29 = smov 64  }
  0x1c   : > { %p1520_p10 = pnand %p1026_p9, %p55_p1  ;;  %s1782_s5 = sld [smem:[#allocation27_spill]] }
  0x1d   : > { %s343_s13 = sshll.u32 %s1779_s1, 4  ;;  %s1766_s30 = smov 4   ;;  %s344_s13 = int_to_ptr.hbm [resolvable:$true] %s343_s13 }
  0x1e   : > { %1029 = dma.hbm_to_vmem [thread:$0]  (!%p1520_p10), %s344_s13, 128, %s346_s16, [#allocation6], %s1765_s29, %s1765_s29, %s1766_s30  }
  0x1f   : > { %s1397_s15 = smov [#allocation8]   ;;  %s1783_s4 = sld [smem:[#allocation26_spill]] }
  0x20   : > { %s379_s26 = sshll.u32 %s1397_s15, 4  ;;  %s1784_s6 = sld [smem:[#allocation28_spill]]  ;;  %s380_s26 = int_to_ptr.vmem [resolvable:$true] %s379_s26 }
  0x21   : > { %s1398_s19 = smov [#allocation7]   ;;  %s1399_s28 = smov [#allocation10]  }
  0x22   : > { %s377_s20 = sshll.u32 %s1782_s5, 4  ;;  %s365_s1 = sshll.u32 %s1398_s19, 4  ;;  %s378_s20 = int_to_ptr.hbm [resolvable:$true] %s377_s20  ;;  %s366_s1 = int_to_ptr.vmem [resolvable:$true] %s365_s1 }
  0x23   : > { %1035 = dma.hbm_to_vmem [thread:$0]  (!%p1520_p10), %s378_s20, 256, %s380_s26, [#allocation9], %s1765_s29, %s1765_s29, %s1766_s30  }
  0x24   : > { %s393_s26 = sshll.u32 %s1399_s28, 4  ;;  %s1555_s20 = sadd.s32 1, %s1392_s24   ;;  %s394_s26 = int_to_ptr.vmem [resolvable:$true] %s393_s26 }
  0x25   : > { %s363_s21 = sshll.u32 %s1783_s4, 4  ;;  %s41_s15 = sadd.s32 1, %s1388_s23  ;;  %s364_s21 = int_to_ptr.hbm [resolvable:$true] %s363_s21 }
  0x26   : > { %s391_s18 = sshll.u32 %s1784_s6, 4  ;;  %s38_s13 = ssub.s32 %s1392_s24, %s1555_s20  ;;  %s392_s18 = int_to_ptr.hbm [resolvable:$true] %s391_s18 }
  0x27   : > { %1032 = dma.hbm_to_vmem [thread:$0]  (!%p1520_p10), %s364_s21, 256, %s366_s1, [#allocation6], %s1765_s29, %s1765_s29, %s1766_s30  }
  0x28   : > { %1038 = dma.hbm_to_vmem [thread:$0]  (!%p1520_p10), %s392_s18, 256, %s394_s26, [#allocation9], %s1765_s29, %s1765_s29, %s1766_s30  }
  0x29   : > { %p48_p12 = scmp.ne.s32.totalorder %s1388_s23, %s1384_s22  ;;  %p39_p13 = scmp.eq.s32.totalorder %s38_s13, 0 }
  0x2a   : > { %p49_p0 = scmp.eq.s32.totalorder %s1392_s24, 0  ;;  %p1057_p5 = scmp.lt.s32.totalorder %s1392_s24, 2 }
  0x2b   : > { %p1565_p3 = por %p267_p2, %p48_p12  ;;  %s416_s17 = sand.u32 1, %s1388_s23  }
  0x2c   : > { %s1571_s16 = scalar_select %p39_p13, %s1388_s23, %s41_s15  }
  0x2d   : > { %p50_p7 = por %p49_p0, %p48_p12  ;;  %s931_s19 = sshll.u32 %s416_s17, 3 }
  0x2e   : > { %s990_s18 = sshll.u32 %s1392_s24, 3  ;;  %s1786_s0 = sld [smem:[#allocation22_spill]] }
  0x2f   : > { %s420_s29 = scalar_lea.vmem [#allocation2], %s931_s19  ;;  %p1578_p2 = pnand %p1057_p5, %p50_p7 }
  0x30   : > { %s428_s30 = sshll.u32 %s420_s29, 4  ;;  %s417_s15 = scalar_lea.sflag [#allocation3], %s416_s17  ;;  %s429_s30 = int_to_ptr.vmem [resolvable:$true] %s428_s30 }
  0x31   : > { %p1232_p10 = pneg %p1578_p2 }
  0x34   : > { %s425_s26 = scalar_lea.hbm %s1786_s0, %s990_s18  ;;  %s1235_s29 = scalar_lea.hbm %s1786_s0, 16 }
  0x35   : > { %s426_s13 = sshll.u32 %s425_s26, 4  ;;  %s427_s13 = int_to_ptr.hbm [resolvable:$true] %s426_s13 }
  0x36   : > { %s1228_s5 = sshra.s32 %s427_s13, 4  ;;  %s1229_s5 = int_to_ptr.hbm [resolvable:$true] %s1228_s5 }
  0x37   : > { %s1230_s6 = scalar_lea.hbm %s1229_s5, 8  ;;  %p1236_p0 = scmp.lt.s32.totalorder %s1229_s5, %s1786_s0 }
  0x38   : > { %p1231_p9 = scmp.ne.s32.totalorder %s1229_s5, %s1230_s6  ;;  %p1237_p5 = scmp.lt.s32.totalorder %s1235_s29, %s1230_s6 }
  0x3a   : > { %p1233_p12 = pnand %p1232_p10, %p1231_p9  ;;  %p1238_p7 = por %p1237_p5, %p1236_p0 }
  0x3c   : > { %p1234_p13 = pneg %p1233_p12 }
  0x3e   : > { %p1239_p11 = pnand %p1238_p7, %p1234_p13 }
  0x40   : > { %1242 = shalt.err (!%p1239_p11)
}
  0x41   : > { %s1788_s17 = smov 4   ;;  %s1789_s26 = smov 64  }
  0x42   : > { %1042 = dma.hbm_to_vmem [thread:$0]  (!%p1578_p2), %s427_s13, 128, %s429_s30, %s417_s15, %s1789_s26, %s1789_s26, %s1788_s17  }
  0x43   : > { %440 = sbr.rel (%p1512_p8) target bundleno = 392 (0x188), region = 60  ;;  %s1598_s18 = sand.u32 (!%p1512_p8), 1, %s1384_s22  }
  0x44   : > { %s1601_s5 = sshll.u32 (!%p1512_p8), %s1598_s18, 3  ;;  %s443_s6 = scalar_lea.sflag (!%p1512_p8), [#allocation3], %s1598_s18 }
  0x45   : > { %s446_s19 = scalar_lea.vmem (!%p1512_p8), [#allocation2], %s1601_s5 }
  0x48   : > { %1359 = dma.done.wait (%p1499_p4), %s443_s6, 128  }
  0x49   : > { %1361 = vsyncadd (%p1499_p4), %s443_s6, 4294967168 }
  0x4a   : > { %1363 = dma.done.wait (%p55_p1), [#allocation6], 384  }
  0x4b   : > { %1365 = vsyncadd (%p55_p1), [#allocation6], 4294966912 }
  0x4c   : > { %1367 = dma.done.wait (%p55_p1), [#allocation9], 512  }
  0x4d   : > { %1369 = vsyncadd (%p55_p1), [#allocation9], 4294966784  ;;  %v992_v0 = vld [vmem:[#allocation5] sm:$0xff]  ;;  %v991_v1 = vld [vmem:[%s446_s19] sm:$0xff]  ;;  %vm538_vm0 = vcmask 130048   ;;  %s1790_s2 = sld [smem:[#allocation24_spill]] }
  0x4e   : > { %549 = vmatpush.bf16.msra.mxu0 %v992_v0  ;;  %v994_v2 = vld [vmem:[#allocation7 + $0x8] sm:$0xff]  ;;  %v996_v3 = vld [vmem:[#allocation8 + $0x8] sm:$0xff]  ;;  %v993_v5 = vld [vmem:[#allocation7] sm:$0xff]  ;;  %s1791_s3 = sld [smem:[#allocation25_spill]]  ;;  %vm591_vm1 = vcmask 261120   ;;  %vm679_vm2 = vcmask 257024  }
  0x4f   : > { %v998_v4 = vld [vmem:[#allocation10 + $0x8] sm:$0xff]  ;;  %601 = vmatpush.bf16.msra.mxu1 %v994_v2  ;;  %635 = vmatpush.bf16.msra.mxu2 %v996_v3  ;;  %v995_v6 = vld [vmem:[#allocation8] sm:$0xff]  ;;  %v997_v7 = vld [vmem:[#allocation10] sm:$0xff]  ;;  %s1792_s7 = sld [smem:[#allocation29_spill]]  ;;  %s1627_s29 = sshll.u32 %s1488_s25, 3 }
  0x50   : > { %669 = vmatpush.bf16.msra.mxu3 %v998_v4  ;;  %v1106_v23 = vld [vmem:[%s1757_s8] ss:$0 sm:$0xff]  ;;  %s503_s6 = scalar_lea.vmem [#allocation11], %s1601_s5  ;;  %s712_s27 = scalar_lea.hbm %s1759_s10, %s1627_s29 }
  0x51   : > { %951 = vmatmul.msk.bf16.vlgmr.msra.gmra.mxu0 %vm538_vm0, %v991_v1  ;;  %v1107_v24 = vld [vmem:[%s1758_s9] ss:$0 sm:$0xff]  ;;  %s713_s14 = sshll.u32 %s503_s6, 4  ;;  %s1641_s30 = sshll.u32 %s712_s27, 4  ;;  %s714_s14 = int_to_ptr.vmem [resolvable:$true] %s713_s14  ;;  %s716_s30 = int_to_ptr.hbm [resolvable:$true] %s1641_s30 }
  0x52   : > { %s1644_s13 = scalar_lea.vmem [#allocation12], %s1601_s5  ;;  %s1650_s15 = scalar_lea.vmem [#allocation14], %s1601_s5 }
  0x53   : > { %602 = vmatpush.bf16.msra.mxu1 %v993_v5  ;;  %636 = vmatpush.bf16.msra.mxu2 %v995_v6  ;;  %v1103_v9 = vld [vmem:[%s1790_s2] ss:$0 sm:$0xff]  ;;  %s729_s17 = scalar_lea.hbm %s1760_s11, %s1627_s29  ;;  %s695_s26 = sand.u32 1, %s1488_s25  }
  0x54   : > { %670 = vmatpush.bf16.msra.mxu3 %v997_v7  ;;  %v1104_v11 = vld [vmem:[%s1791_s3] ss:$0 sm:$0xff]  ;;  %s746_s27 = scalar_lea.hbm %s1761_s12, %s1627_s29  ;;  %s691_s0 = scalar_lea.sflag [#allocation4], %s1598_s18 }
  0x55   : > { %v1105_v19 = vld [vmem:[%s1792_s7] ss:$0 sm:$0xff]  ;;  %s1272_s2 = sshra.s32 %s716_s30, 4  ;;  %s1278_s1 = scalar_lea.hbm %s1759_s10, 16  ;;  %s1273_s2 = int_to_ptr.hbm [resolvable:$true] %s1272_s2 }
  0x56   : > { %s1274_s5 = scalar_lea.hbm %s1273_s2, 8  ;;  %p1279_p11 = scmp.lt.s32.totalorder %s1273_s2, %s1759_s10 }
  0x57   : > { %p1275_p1 = scmp.ne.s32.totalorder %s1273_s2, %s1274_s5  ;;  %p1280_p2 = scmp.lt.s32.totalorder %s1278_s1, %s1274_s5 }
  0x59   : > { %p1276_p4 = pnand %p1275_p1, %p1565_p3  ;;  %p1281_p9 = por %p1280_p2, %p1279_p11 }
  0x5b   : > { %p1277_p8 = pneg %p1276_p4 }
  0x5d   : > { %p1282_p10 = pnand %p1281_p9, %p1277_p8 }
  0xce   : > { %v551_v8 = vpop.f32.mrf.mxu0 }
  0xcf   : > { %v560_v10 = vmul.f32 %v1103_v9, %v551_v8 }
  0xd1   : > { %v566_v13 = vadd.f32 %v1104_v11, %v560_v10 }
  0xd3   : > { %v568_v16 = vmax.f32 %v566_v13, 0.0 }
  0xd6   : > { %v553_v12 = vpop.f32.mrf.mxu0 }
  0xd7   : > { %v561_v14 = vmul.f32 %v1103_v9, %v553_v12 }
  0xd9   : > { %v567_v15 = vadd.f32 %v1104_v11, %v561_v14 }
  0xdb   : > { %v569_v17 = vmax.f32 %v567_v15, 0.0 }
  0xdd   : > { %v570_v18 = vpack.c.bf16 %v569_v17, %v568_v16 }
  0xdf   : > { %960 = vmatmul.msk.bf16.vlgmr.msra.gmra.mxu1 %vm591_vm1, %v570_v18  ;;  %969 = vmatmul.msk.bf16.vlgmr.msra.gmra.mxu2 %vm591_vm1, %v570_v18 }
  0xe0   : > { %978 = vmatmul.msk.bf16.vlgmr.msra.gmra.mxu3 %vm591_vm1, %v570_v18 }
 0x15c   : > { %v604_v20 = vpop.f32.mrf.mxu1 }
 0x15d   : > { %v605_v21 = vadd.f32 %v1105_v19, %v604_v20 }
 0x15f   : > { %v677_v22 = vpack.c.bf16 %v605_v21, %v605_v21 }
 0x161   : > { %680 = vst.msk [vmem:[%s503_s6] sm:$0xf] %vm679_vm2, %v677_v22 }
 0x162   : > { %v638_v25 = vpop.f32.mrf.mxu2 }
 0x163   : > { %v639_v26 = vadd.f32 %v1106_v23, %v638_v25  ;;  %v672_v27 = vpop.f32.mrf.mxu3 }
 0x164   : > { %v673_v28 = vadd.f32 %v1107_v24, %v672_v27  ;;  %v606_v29 = vpop.f32.mrf.mxu1 }
 0x165   : > { %v682_v30 = vpack.c.bf16 %v639_v26, %v639_v26  ;;  %v607_v31 = vadd.f32 %v1105_v19, %v606_v29 }
 0x166   : > { %v686_v32 = vpack.c.bf16 %v673_v28, %v673_v28 }
 0x167   : > { %684 = vst.msk [vmem:[%s1644_s13] sm:$0xf] %vm679_vm2, %v682_v30  ;;  %v678_v33 = vpack.c.bf16 %v607_v31, %v607_v31 }
 0x168   : > { %688 = vst.msk [vmem:[%s1650_s15] sm:$0xf] %vm679_vm2, %v686_v32 }
 0x169   : > { %681 = vst.msk [vmem:[%s503_s6 + $0x4] sm:$0xf] %vm679_vm2, %v678_v33 }
 0x16a   : > { %v640_v34 = vpop.f32.mrf.mxu2 }
 0x16b   : > { %1285 = shalt.err (!%p1282_p10)
}
 0x16c   : > { %s1400_s18 = smov 64   ;;  %s1401_s29 = smov 4   ;;  %v641_v35 = vadd.f32 %v1106_v23, %v640_v34  ;;  %v674_v36 = vpop.f32.mrf.mxu3 }
 0x16d   : > { %1020 = dma.vmem_to_hbm [thread:$0]  (%p1565_p3), %s714_s14, 128, %s716_s30, %s691_s0, %s1400_s18, %s1400_s18, %s1401_s29   ;;  %v675_v37 = vadd.f32 %v1107_v24, %v674_v36 }
 0x16e   : > { %s730_s3 = sshll.u32 %s1644_s13, 4  ;;  %s1679_s2 = sshll.u32 %s729_s17, 4  ;;  %v683_v38 = vpack.c.bf16 %v641_v35, %v641_v35  ;;  %s731_s3 = int_to_ptr.vmem [resolvable:$true] %s730_s3  ;;  %s733_s2 = int_to_ptr.hbm [resolvable:$true] %s1679_s2 }
 0x16f   : > { %s747_s7 = sshll.u32 %s1650_s15, 4  ;;  %s1682_s19 = sshll.u32 %s746_s27, 4  ;;  %v687_v39 = vpack.c.bf16 %v675_v37, %v675_v37  ;;  %s1685_s7 = int_to_ptr.vmem [resolvable:$true] %s747_s7  ;;  %s750_s19 = int_to_ptr.hbm [resolvable:$true] %s1682_s19 }
 0x170   : > { %685 = vst.msk [vmem:[%s1644_s13 + $0x4] sm:$0xf] %vm679_vm2, %v683_v38  ;;  %s1694_s0 = scalar_lea.sflag [#allocation13], %s695_s26  ;;  %s1300_s14 = sshra.s32 %s733_s2, 4  ;;  %s1301_s14 = int_to_ptr.hbm [resolvable:$true] %s1300_s14 }
 0x171   : > { %689 = vst.msk [vmem:[%s1650_s15 + $0x4] sm:$0xf] %vm679_vm2, %v687_v39  ;;  %s1302_s30 = scalar_lea.hbm %s1301_s14, 8  ;;  %s1306_s27 = scalar_lea.hbm %s1760_s11, 16 }
 0x172   : > { %p1303_p12 = scmp.ne.s32.totalorder %s1301_s14, %s1302_s30  ;;  %p1307_p5 = scmp.lt.s32.totalorder %s1301_s14, %s1760_s11 }
 0x173   : > { %p1308_p7 = scmp.lt.s32.totalorder %s1306_s27, %s1302_s30 }
 0x174   : > { %p1304_p13 = pnand %p1303_p12, %p1565_p3 }
 0x175   : > { %p1309_p1 = por %p1308_p7, %p1307_p5 }
 0x176   : > { %p1305_p0 = pneg %p1304_p13 }
 0x178   : > { %p1310_p4 = pnand %p1309_p1, %p1305_p0 }
 0x17a   : > { %1313 = shalt.err (!%p1310_p4)
}
 0x17b   : > { %1021 = dma.vmem_to_hbm [thread:$0]  (%p1565_p3), %s731_s3, 128, %s733_s2, %s1694_s0, %s1400_s18, %s1400_s18, %s1401_s29  }
 0x17c   : > { %s1328_s25 = sshra.s32 %s750_s19, 4  ;;  %s1334_s28 = scalar_lea.hbm %s1761_s12, 16  ;;  %s1329_s25 = int_to_ptr.hbm [resolvable:$true] %s1328_s25 }
 0x17d   : > { %s1330_s13 = scalar_lea.hbm %s1329_s25, 8  ;;  %p1335_p9 = scmp.lt.s32.totalorder %s1329_s25, %s1761_s12 }
 0x17e   : > { %p1331_p8 = scmp.ne.s32.totalorder %s1329_s25, %s1330_s13  ;;  %p1336_p10 = scmp.lt.s32.totalorder %s1334_s28, %s1330_s13 }
 0x180   : > { %p1332_p11 = pnand %p1331_p8, %p1565_p3  ;;  %p1337_p12 = por %p1336_p10, %p1335_p9 }
 0x182   : > { %p1333_p2 = pneg %p1332_p11 }
 0x184   : > { %p1338_p13 = pnand %p1337_p12, %p1333_p2 }
 0x186   : > { %1341 = shalt.err (!%p1338_p13)
}
 0x187   : > { %1022 = dma.vmem_to_hbm [thread:$0]  (%p1565_p3), %s1685_s7, 128, %s750_s19, %s1694_s0, %s1400_s18, %s1400_s18, %s1401_s29  }
 0x188 PF: > { %s1793_s3 = sld [smem:[#allocation20_spill]]  ;;  %p1795_p0 = scmp.ge.s32.totalorder %s1392_s24, 2 }
 0x18a   : > { %p1044_p5 = pnand %p1795_p0, %p1504_p6 }
 0x18c   : > { %p1045_p7 = pneg %p1044_p5 }
 0x18e   : > { %s764_s30 = sand.u32 1, %s1793_s3  }
 0x18f   : > { %s765_s17 = scalar_lea.sflag [#allocation4], %s764_s30 }
 0x190   : > { %1371 = dma.done.wait (%p1045_p7), %s765_s17, 128  }
 0x191   : > { %1373 = vsyncadd (%p1045_p7), %s765_s17, 4294967168  ;;  %s1796_s21 = sadd.s32 4294967294, %s1392_s24  }
 0x192   : > { %s774_s4 = sand.u32 1, %s1796_s21  }
 0x193   : > { %s775_s27 = scalar_lea.sflag [#allocation13], %s774_s4 }
 0x194   : > { %1375 = dma.done.wait (%p1045_p7), %s775_s27, 256  }
 0x195   : > { %1377 = vsyncadd (%p1045_p7), %s775_s27, 4294967040  ;;  %p31_p3 = scmp.ge.s32.totalorder %s1555_s20, 4   ;;  %s1797_s21 = smov %s1384_s22 }
 0x196   : > { %s1798_s22 = smov %s1388_s23  ;;  %s1799_s23 = smov %s1571_s16 }
 0x197   : > { %s1800_s24 = smov %s1555_s20  ;;  %33 = sbr.rel (!%p31_p3) target bundleno = 18 (0x12), region = 153 }
 0x19c   :  { %791 = vsyncpa [#allocation3], 1 }
 0x19d   :  { %793 = vsyncpa [#allocation3 + $0x1], 1 }
 0x19e   :  { %794 = vsyncpa [#allocation6], 1 }
 0x19f   :  { %795 = vsyncpa [#allocation9], 1 }
 0x1a0   :  { %796 = vsyncpa [#allocation4], 1 }
 0x1a1   :  { %798 = vsyncpa [#allocation4 + $0x1], 1 }
 0x1a2   :  { %799 = vsyncpa [#allocation13], 1 }
 0x1a3   :  { %801 = vsyncpa [#allocation13 + $0x1], 1 }

</bundles_post_ra>
